<compile_context>
chip_gen: v6e
topology: v6e:2x2x1
jax: 0.10.0
libtpu: 0.0.40
codegen_flags: <defaults>
</compile_context>

<pallas_src>
import jax
import jax.numpy as jnp
from jax.experimental import pallas as pl
from jax.experimental.pallas import tpu as pltpu


def _round_up(n, m):
    return ((n + m - 1) // m) * m


def _fused_mlp_kernel(x_ref, w1_ref, w2_ref, w3_ref, w4_ref, b_ref, o_ref):
    # x_ref : (TB, IN_P)    bf16
    # w1_ref: (IN_P, HID_P) bf16    w2/w3: (HID_P, HID_P) bf16
    # w4_ref: (HID_P, OUT_P) bf16
    # b_ref : (8, HID_P)    f32  (rows 0..3 hold the 4 biases; row 3's first
    #                             OUT_P lanes are the output bias)
    # o_ref : (TB, OUT_P)   f32
    out_p = o_ref.shape[-1]

    def layer(h_bf16, w_ref, b_row):
        y = jnp.dot(h_bf16, w_ref[...], preferred_element_type=jnp.float32)
        return jnp.maximum(y + b_row, 0.0)

    h = layer(x_ref[...], w1_ref, b_ref[0:1, :])
    h = layer(h.astype(jnp.bfloat16), w2_ref, b_ref[1:2, :])
    h = layer(h.astype(jnp.bfloat16), w3_ref, b_ref[2:3, :])
    h = layer(h.astype(jnp.bfloat16), w4_ref, b_ref[3:4, :out_p])
    o_ref[...] = h.astype(o_ref.dtype)


def _prepare_params(params, in_p, hid_p, out_p):
    """Zero-pad to lane multiples, cast weights to bf16, pack biases."""
    (w1, b1), (w2, b2), (w3, b3), (w4, b4) = params

    def pad_w(w, rows, cols):
        r, c = w.shape
        return jnp.pad(w, ((0, rows - r), (0, cols - c))).astype(jnp.bfloat16)

    def pad_b(b, cols):
        return jnp.pad(b, (0, cols - b.shape[0]))

    w1p = pad_w(w1, in_p, hid_p)
    w2p = pad_w(w2, hid_p, hid_p)
    w3p = pad_w(w3, hid_p, hid_p)
    w4p = pad_w(w4, hid_p, out_p)
    # 8 sublanes keeps the block (8, HID_P)-tile aligned; rows 4..7 unused.
    b_all = jnp.zeros((8, hid_p), jnp.float32)
    b_all = b_all.at[0].set(pad_b(b1, hid_p))
    b_all = b_all.at[1].set(pad_b(b2, hid_p))
    b_all = b_all.at[2].set(pad_b(b3, hid_p))
    b_all = b_all.at[3].set(pad_b(b4, hid_p))
    return w1p, w2p, w3p, w4p, b_all


def my_mlp_forward(x, params, *, tile_b=None):
    """Fused 4-layer MLP forward: ReLU(...ReLU(x @ W1 + b1)... @ W4 + b4)."""
    B, in_features = x.shape
    hidden = params[0][0].shape[1]
    out_features = params[3][0].shape[1]

    in_p = _round_up(in_features, 128)    # 32  -> 128
    hid_p = _round_up(hidden, 128)        # 200 -> 256
    out_p = _round_up(out_features, 128)  # 16  -> 128

    if tile_b is None:
        # 512-row tiles hit ~85%+ of HBM roofline at large batch; multiple of
        # 16 for bf16 sublane packing.
        tile_b = _round_up(min(B, 512), 16)
    b_p = _round_up(B, tile_b)

    x_pad = jnp.pad(
        x, ((0, b_p - B), (0, in_p - in_features))
    ).astype(jnp.bfloat16)
    w1p, w2p, w3p, w4p, b_all = _prepare_params(params, in_p, hid_p, out_p)

    const = lambda i: (0, 0)  # weights/bias resident across all batch tiles
    out = pl.pallas_call(
        _fused_mlp_kernel,
        out_shape=jax.ShapeDtypeStruct((b_p, out_p), jnp.float32),
        grid_spec=pltpu.PrefetchScalarGridSpec(
            num_scalar_prefetch=0,
            grid=(b_p // tile_b,),
            in_specs=[
                pl.BlockSpec((tile_b, in_p), lambda i: (i, 0)),
                pl.BlockSpec((in_p, hid_p), const),
                pl.BlockSpec((hid_p, hid_p), const),
                pl.BlockSpec((hid_p, hid_p), const),
                pl.BlockSpec((hid_p, out_p), const),
                pl.BlockSpec((8, hid_p), const),
            ],
            out_specs=pl.BlockSpec((tile_b, out_p), lambda i: (i, 0)),
        ),
        compiler_params=pltpu.CompilerParams(
            dimension_semantics=("parallel",),
        ),
    )(x_pad, w1p, w2p, w3p, w4p, b_all)

    return out[:B, :out_features]


def init_mlp_params(key, in_features, out_features, hidden=200):
    """Deterministic parameter init (uniform, PyTorch-Linear-style bounds).

    Weights stored as (in_features, out_features) so y = x @ W + b
    (== PyTorch's x @ W_pt.T + b with W_pt of shape (out, in))."""
    dims = [in_features, hidden, hidden, hidden, out_features]
    params = []
    for li in range(4):
        fan_in, fan_out = dims[li], dims[li + 1]
        key, kw, kb = jax.random.split(key, 3)
        bound = 1.0 / (fan_in ** 0.5)
        w = jax.random.uniform(kw, (fan_in, fan_out), jnp.float32, -bound, bound)
        b = jax.random.uniform(kb, (fan_out,), jnp.float32, -bound, bound)
        params.append((w, b))
    return params


def my_mlp_reference_f32(x, params):
    h = x
    for w, b in params:
        h = jnp.maximum(h @ w + b[None, :], 0.0)
    return h


def my_mlp_reference_mixed(x, params):
    """Emulates the kernel's precision: bf16 matmul inputs, f32 accumulate."""
    h = x.astype(jnp.bfloat16)
    for li, (w, b) in enumerate(params):
        y = jnp.dot(h, w.astype(jnp.bfloat16),
                    preferred_element_type=jnp.float32)
        y = jnp.maximum(y + b[None, :], 0.0)
        h = y.astype(jnp.bfloat16) if li < len(params) - 1 else y
    return h


if __name__ == "__main__":
    key = jax.random.PRNGKey(0)
    batch, in_features, out_features = 8, 32, 16

    kx, kp = jax.random.split(key)
    x = jax.random.normal(kx, (batch, in_features), jnp.float32)
    params = init_mlp_params(kp, in_features, out_features)

    out = my_mlp_forward(x, params)
    out = jax.block_until_ready(out)
    assert out.shape == (batch, out_features), out.shape

    # Tight check against a reference with identical mixed precision.
    ref_mixed = my_mlp_reference_mixed(x, params)
    assert jnp.allclose(out, ref_mixed, atol=1e-3, rtol=1e-3), \
        "mismatch vs mixed-precision reference"

    # Loose sanity check against the pure-f32 reference (bf16 matmul drift).
    ref_f32 = my_mlp_reference_f32(x, params)
    assert jnp.allclose(out, ref_f32, atol=1e-1, rtol=1e-1), \
        "mismatch vs f32 reference"

    print("KERNEL_OK")
</pallas_src>

<mosaic_0001>
module attributes {stable_mosaic.version = 11 : i64} {
  func.func @_fused_mlp_kernel(%arg0: i32, %arg1: memref<16x128xbf16, #tpu.memory_space<vmem>>, %arg2: memref<128x256xbf16, #tpu.memory_space<vmem>>, %arg3: memref<256x256xbf16, #tpu.memory_space<vmem>>, %arg4: memref<256x256xbf16, #tpu.memory_space<vmem>>, %arg5: memref<256x128xbf16, #tpu.memory_space<vmem>>, %arg6: memref<8x256xf32, #tpu.memory_space<vmem>>, %arg7: memref<16x128xf32, #tpu.memory_space<vmem>>) attributes {dimension_semantics = [#tpu.dimension_semantics<parallel>], iteration_bounds = array<i64: 1>, scalar_prefetch = 0 : i64, scratch_operands = 0 : i64, tpu.core_type = #tpu.core_type<tc>, window_params = [{transform_indices = @transform_0, window_bounds = array<i64: 16, 128>}, {pipeline_mode = #tpu.pipeline_mode<synchronous>, transform_indices = @transform_1, window_bounds = array<i64: 128, 256>}, {pipeline_mode = #tpu.pipeline_mode<synchronous>, transform_indices = @transform_2, window_bounds = array<i64: 256, 256>}, {pipeline_mode = #tpu.pipeline_mode<synchronous>, transform_indices = @transform_3, window_bounds = array<i64: 256, 256>}, {pipeline_mode = #tpu.pipeline_mode<synchronous>, transform_indices = @transform_4, window_bounds = array<i64: 256, 128>}, {pipeline_mode = #tpu.pipeline_mode<synchronous>, transform_indices = @transform_5, window_bounds = array<i64: 8, 256>}, {transform_indices = @transform_6, window_bounds = array<i64: 16, 128>}]} {
    %c0 = arith.constant 0 : index
    %c0_0 = arith.constant 0 : index
    %0 = vector.load %arg1[%c0, %c0_0] : memref<16x128xbf16, #tpu.memory_space<vmem>>, vector<16x128xbf16>
    %c0_1 = arith.constant 0 : index
    %c0_2 = arith.constant 0 : index
    %1 = vector.load %arg6[%c0_1, %c0_2] : memref<8x256xf32, #tpu.memory_space<vmem>>, vector<1x256xf32>
    %c0_3 = arith.constant 0 : index
    %c0_4 = arith.constant 0 : index
    %2 = vector.load %arg2[%c0_3, %c0_4] : memref<128x256xbf16, #tpu.memory_space<vmem>>, vector<128x256xbf16>
    %cst = arith.constant dense<0.000000e+00> : vector<16x256xf32>
    %3 = tpu.matmul %0, %2, %cst {dimension_numbers = #tpu.dot_dimension_numbers<[1], [0], [0], [1], [0, 0, 1, 1], [], []>} : vector<16x128xbf16>, vector<128x256xbf16>, vector<16x256xf32> -> vector<16x256xf32>
    %4 = vector.broadcast %1 : vector<1x256xf32> to vector<16x256xf32>
    %5 = arith.addf %3, %4 : vector<16x256xf32>
    %cst_5 = arith.constant 0.000000e+00 : f32
    %6 = vector.broadcast %cst_5 : f32 to vector<16x256xf32>
    %7 = arith.maximumf %5, %6 : vector<16x256xf32>
    %8 = arith.truncf %7 : vector<16x256xf32> to vector<16x256xbf16>
    %c1 = arith.constant 1 : index
    %c0_6 = arith.constant 0 : index
    %9 = vector.load %arg6[%c1, %c0_6] : memref<8x256xf32, #tpu.memory_space<vmem>>, vector<1x256xf32>
    %c0_7 = arith.constant 0 : index
    %c0_8 = arith.constant 0 : index
    %10 = vector.load %arg3[%c0_7, %c0_8] : memref<256x256xbf16, #tpu.memory_space<vmem>>, vector<256x256xbf16>
    %cst_9 = arith.constant dense<0.000000e+00> : vector<16x256xf32>
    %11 = tpu.matmul %8, %10, %cst_9 {dimension_numbers = #tpu.dot_dimension_numbers<[1], [0], [0], [1], [0, 0, 1, 1], [], []>} : vector<16x256xbf16>, vector<256x256xbf16>, vector<16x256xf32> -> vector<16x256xf32>
    %12 = vector.broadcast %9 : vector<1x256xf32> to vector<16x256xf32>
    %13 = arith.addf %11, %12 : vector<16x256xf32>
    %cst_10 = arith.constant 0.000000e+00 : f32
    %14 = vector.broadcast %cst_10 : f32 to vector<16x256xf32>
    %15 = arith.maximumf %13, %14 : vector<16x256xf32>
    %16 = arith.truncf %15 : vector<16x256xf32> to vector<16x256xbf16>
    %c2 = arith.constant 2 : index
    %c0_11 = arith.constant 0 : index
    %17 = vector.load %arg6[%c2, %c0_11] : memref<8x256xf32, #tpu.memory_space<vmem>>, vector<1x256xf32>
    %c0_12 = arith.constant 0 : index
    %c0_13 = arith.constant 0 : index
    %18 = vector.load %arg4[%c0_12, %c0_13] : memref<256x256xbf16, #tpu.memory_space<vmem>>, vector<256x256xbf16>
    %cst_14 = arith.constant dense<0.000000e+00> : vector<16x256xf32>
    %19 = tpu.matmul %16, %18, %cst_14 {dimension_numbers = #tpu.dot_dimension_numbers<[1], [0], [0], [1], [0, 0, 1, 1], [], []>} : vector<16x256xbf16>, vector<256x256xbf16>, vector<16x256xf32> -> vector<16x256xf32>
    %20 = vector.broadcast %17 : vector<1x256xf32> to vector<16x256xf32>
    %21 = arith.addf %19, %20 : vector<16x256xf32>
    %cst_15 = arith.constant 0.000000e+00 : f32
    %22 = vector.broadcast %cst_15 : f32 to vector<16x256xf32>
    %23 = arith.maximumf %21, %22 : vector<16x256xf32>
    %24 = arith.truncf %23 : vector<16x256xf32> to vector<16x256xbf16>
    %c3 = arith.constant 3 : index
    %c0_16 = arith.constant 0 : index
    %25 = vector.load %arg6[%c3, %c0_16] : memref<8x256xf32, #tpu.memory_space<vmem>>, vector<1x128xf32>
    %c0_17 = arith.constant 0 : index
    %c0_18 = arith.constant 0 : index
    %26 = vector.load %arg5[%c0_17, %c0_18] : memref<256x128xbf16, #tpu.memory_space<vmem>>, vector<256x128xbf16>
    %cst_19 = arith.constant dense<0.000000e+00> : vector<16x128xf32>
    %27 = tpu.matmul %24, %26, %cst_19 {dimension_numbers = #tpu.dot_dimension_numbers<[1], [0], [0], [1], [0, 0, 1, 1], [], []>} : vector<16x256xbf16>, vector<256x128xbf16>, vector<16x128xf32> -> vector<16x128xf32>
    %28 = vector.broadcast %25 : vector<1x128xf32> to vector<16x128xf32>
    %29 = arith.addf %27, %28 : vector<16x128xf32>
    %cst_20 = arith.constant 0.000000e+00 : f32
    %30 = vector.broadcast %cst_20 : f32 to vector<16x128xf32>
    %31 = arith.maximumf %29, %30 : vector<16x128xf32>
    %c0_21 = arith.constant 0 : index
    %c0_22 = arith.constant 0 : index
    %32 = vector.load %arg7[%c0_21, %c0_22] : memref<16x128xf32, #tpu.memory_space<vmem>>, vector<16x128xf32>
    tpu.vector_store %arg7[%c0_21, %c0_22], %31 {strides = array<i32>} : memref<16x128xf32, #tpu.memory_space<vmem>>, vector<16x128xf32>,
    return
  }
  func.func @transform_0(%arg0: i32) -> (i32, i32) {
    %c0_i32 = arith.constant 0 : i32
    %c0_i32_0 = arith.constant 0 : i32
    return %arg0, %c0_i32 : i32, i32
  }
  func.func @transform_1(%arg0: i32) -> (i32, i32) {
    %c0_i32 = arith.constant 0 : i32
    %c0_i32_0 = arith.constant 0 : i32
    %c0_i32_1 = arith.constant 0 : i32
    return %c0_i32, %c0_i32_0 : i32, i32
  }
  func.func @transform_2(%arg0: i32) -> (i32, i32) {
    %c0_i32 = arith.constant 0 : i32
    %c0_i32_0 = arith.constant 0 : i32
    %c0_i32_1 = arith.constant 0 : i32
    return %c0_i32, %c0_i32_0 : i32, i32
  }
  func.func @transform_3(%arg0: i32) -> (i32, i32) {
    %c0_i32 = arith.constant 0 : i32
    %c0_i32_0 = arith.constant 0 : i32
    %c0_i32_1 = arith.constant 0 : i32
    return %c0_i32, %c0_i32_0 : i32, i32
  }
  func.func @transform_4(%arg0: i32) -> (i32, i32) {
    %c0_i32 = arith.constant 0 : i32
    %c0_i32_0 = arith.constant 0 : i32
    %c0_i32_1 = arith.constant 0 : i32
    return %c0_i32, %c0_i32_0 : i32, i32
  }
  func.func @transform_5(%arg0: i32) -> (i32, i32) {
    %c0_i32 = arith.constant 0 : i32
    %c0_i32_0 = arith.constant 0 : i32
    %c0_i32_1 = arith.constant 0 : i32
    return %c0_i32, %c0_i32_0 : i32, i32
  }
  func.func @transform_6(%arg0: i32) -> (i32, i32) {
    %c0_i32 = arith.constant 0 : i32
    %c0_i32_0 = arith.constant 0 : i32
    return %arg0, %c0_i32 : i32, i32
  }
}

</mosaic_0001>

<bundles_post_ra>
// kernel: tpu_custom_call.1
= control target key start
LH: loop header
LB: loop body
LE: loop exit
PB: predicated region body
PF: predicated region fallthrough
CT: control target
= control target key end

     0   :  { %11 = vsyncpa [#allocation3], 0  ;;  %s1480_s0 = inlined_call_operand.hbm [shape: bf16[16,128], index: 0, kind: input, shape index: {}]   ;;  %s1481_s1 = inlined_call_operand.hbm [shape: bf16[128,256], index: 1, kind: input, shape index: {}]   ;;  %s1482_s2 = inlined_call_operand.hbm [shape: bf16[256,256], index: 2, kind: input, shape index: {}]   ;;  %s1483_s3 = inlined_call_operand.hbm [shape: bf16[256,256], index: 3, kind: input, shape index: {}]   ;;  %s1484_s4 = inlined_call_operand.hbm [shape: bf16[256,128], index: 4, kind: input, shape index: {}]   ;;  %s1485_s5 = inlined_call_operand.hbm [shape: f32[8,256], index: 5, kind: input, shape index: {}]   ;;  %s1486_s6 = inlined_call_operand.hbm [shape: f32[16,128], index: 6, kind: output, shape index: {}]  }
   0x1   :  { %12 = vsyncpa [#allocation6], 0 }
   0x2   :  { %13 = vsyncpa [#allocation9], 0 }
   0x3   :  { %14 = vsyncpa [#allocation12], 0 }
   0x4   :  { %15 = vsyncpa [#allocation4], 0  ;;  %s1390_s21 = smov [#allocation5]  }
   0x5   :  { %s33_s22 = sshll.u32 %s1390_s21, 4  ;;  %s34_s22 = int_to_ptr.vmem [resolvable:$true] %s33_s22 }
   0x6   :  { %s1248_s23 = scalar_lea.vmem %s34_s22, 2048  ;;  %p1253_p1 = scmp.lt.s32.totalorder %s34_s22, %s34_s22 }
   0x7   :  { %p1249_p0 = scmp.ne.s32.totalorder %s34_s22, %s1248_s23  ;;  %p1254_p2 = scmp.lt.s32.totalorder %s1248_s23, %s1248_s23 }
   0x9   :  { %p1255_p3 = por %p1254_p2, %p1253_p1 }
   0xb   :  { %p1256_p4 = pnand %p1255_p3, %p1249_p0 }
   0xd   :  { %1259 = shalt.err (!%p1256_p4)
}
   0xe   :  { %s1391_s24 = smov 128   ;;  %s1392_s25 = smov 8  }
   0xf   :  { %39 = dma.hbm_to_vmem [thread:$0]  %s1481_s1, 2048, %s34_s22, [#allocation6], %s1391_s24, %s1391_s24, %s1392_s25  }
  0x10   :  { %s1393_s28 = smov [#allocation8]   ;;  %s1394_s30 = smov [#allocation2]  }
  0x11   :  { %s57_s29 = sshll.u32 %s1393_s28, 4  ;;  %s21_s7 = sshll.u32 %s1394_s30, 4  ;;  %s58_s29 = int_to_ptr.vmem [resolvable:$true] %s57_s29  ;;  %s22_s7 = int_to_ptr.vmem [resolvable:$true] %s21_s7 }
  0x12   :  { %s1268_s8 = scalar_lea.vmem %s58_s29, 4096  ;;  %p1273_p6 = scmp.lt.s32.totalorder %s58_s29, %s58_s29 }
  0x13   :  { %p1269_p5 = scmp.ne.s32.totalorder %s58_s29, %s1268_s8  ;;  %p1274_p7 = scmp.lt.s32.totalorder %s1268_s8, %s1268_s8 }
  0x15   :  { %p1275_p8 = por %p1274_p7, %p1273_p6 }
  0x17   :  { %p1276_p9 = pnand %p1275_p8, %p1269_p5 }
  0x19   :  { %1279 = shalt.err (!%p1276_p9)
}
  0x1a   :  { %63 = dma.hbm_to_vmem [thread:$0]  %s1483_s3, 4096, %s58_s29, [#allocation9], %s1391_s24, %s1391_s24, %s1392_s25  }
  0x1b   :  { %s1288_s1 = scalar_lea.vmem %s22_s7, 128  ;;  %p1293_p11 = scmp.lt.s32.totalorder %s22_s7, %s22_s7 }
  0x1c   :  { %p1289_p10 = scmp.ne.s32.totalorder %s22_s7, %s1288_s1  ;;  %p1294_p12 = scmp.lt.s32.totalorder %s1288_s1, %s1288_s1 }
  0x1e   :  { %p1295_p13 = por %p1294_p12, %p1293_p11 }
  0x20   :  { %p1296_p0 = pnand %p1295_p13, %p1289_p10 }
  0x22   :  { %1299 = shalt.err (!%p1296_p0)
}
  0x23   :  { %s1395_s11 = smov 64   ;;  %s1396_s12 = smov 4  }
  0x24   :  { %27 = dma.hbm_to_vmem [thread:$0]  %s1480_s0, 128, %s22_s7, [#allocation3], %s1395_s11, %s1395_s11, %s1396_s12  }
  0x25   :  { %s1397_s15 = smov [#allocation7]   ;;  %s1398_s17 = smov [#allocation10]  }
  0x26   :  { %s45_s16 = sshll.u32 %s1397_s15, 4  ;;  %s69_s18 = sshll.u32 %s1398_s17, 4  ;;  %s46_s16 = int_to_ptr.vmem [resolvable:$true] %s45_s16  ;;  %s70_s18 = int_to_ptr.vmem [resolvable:$true] %s69_s18 }
  0x27   :  { %s1308_s3 = scalar_lea.vmem %s46_s16, 4096  ;;  %p1313_p2 = scmp.lt.s32.totalorder %s46_s16, %s46_s16 }
  0x28   :  { %p1309_p1 = scmp.ne.s32.totalorder %s46_s16, %s1308_s3  ;;  %p1314_p3 = scmp.lt.s32.totalorder %s1308_s3, %s1308_s3 }
  0x2a   :  { %p1315_p4 = por %p1314_p3, %p1313_p2 }
  0x2c   :  { %p1316_p5 = pnand %p1315_p4, %p1309_p1 }
  0x2e   :  { %1319 = shalt.err (!%p1316_p5)
}
  0x2f   :  { %51 = dma.hbm_to_vmem [thread:$0]  %s1482_s2, 4096, %s46_s16, [#allocation6], %s1391_s24, %s1391_s24, %s1392_s25  }
  0x30   :  { %s1328_s0 = scalar_lea.vmem %s70_s18, 2048  ;;  %p1333_p7 = scmp.lt.s32.totalorder %s70_s18, %s70_s18 }
  0x31   :  { %p1329_p6 = scmp.ne.s32.totalorder %s70_s18, %s1328_s0  ;;  %p1334_p8 = scmp.lt.s32.totalorder %s1328_s0, %s1328_s0 }
  0x33   :  { %p1335_p9 = por %p1334_p8, %p1333_p7 }
  0x35   :  { %p1336_p10 = pnand %p1335_p9, %p1329_p6 }
  0x37   :  { %1339 = shalt.err (!%p1336_p10)
}
  0x38   :  { %75 = dma.hbm_to_vmem [thread:$0]  %s1484_s4, 2048, %s70_s18, [#allocation9], %s1395_s11, %s1395_s11, %s1396_s12  }
  0x39   :  { %s1399_s23 = smov [#allocation11]  }
  0x3a   :  { %s82_s26 = sshll.u32 %s1399_s23, 4  ;;  %s83_s26 = int_to_ptr.vmem [resolvable:$true] %s82_s26 }
  0x3b   :  { %s1348_s27 = scalar_lea.vmem %s83_s26, 256  ;;  %p1353_p12 = scmp.lt.s32.totalorder %s83_s26, %s83_s26 }
  0x3c   :  { %p1349_p11 = scmp.ne.s32.totalorder %s83_s26, %s1348_s27  ;;  %p1354_p13 = scmp.lt.s32.totalorder %s1348_s27, %s1348_s27 }
  0x3e   :  { %p1355_p0 = por %p1354_p13, %p1353_p12 }
  0x40   :  { %p1356_p1 = pnand %p1355_p0, %p1349_p11 }
  0x42   :  { %1359 = shalt.err (!%p1356_p1)
}
  0x43   :  { %85 = dma.hbm_to_vmem [thread:$0]  %s1485_s5, 256, %s83_s26, [#allocation12]  }
  0x44   :  { %1380 = dma.done.wait [#allocation3], 128  }
  0x45   :  { %1381 = vsyncadd [#allocation3], 4294967168 }
  0x46   :  { %1382 = dma.done.wait [#allocation6], 6144  }
  0x47   :  { %1383 = vsyncadd [#allocation6], 4294961152 }
  0x48   :  { %1384 = dma.done.wait [#allocation9], 6144  }
  0x49   :  { %1385 = vsyncadd [#allocation9], 4294961152 }
  0x4a   :  { %1386 = dma.done.wait [#allocation12], 256  }
  0x4b   :  { %1387 = vsyncadd [#allocation12], 4294967040  ;;  %v1400_v0 = vmov 0   ;;  %v1103_v1 = vld [vmem:[#allocation5 + $0x74] ss:$8 sps:$4 sm:$0xff]   ;;  %s1401_s4 = smov [#allocation13]  }
  0x4c   :  { %253 = vmatprep.mubr.bf16.mxu0 %v1400_v0  ;;  %v1105_v2 = vld [vmem:[#allocation5 + $0x70] ss:$8 sps:$4 sm:$0xff]   ;;  %221 = vmatprep.subr.bf16.mxu0 %v1103_v1  ;;  %v1106_v3 = vld [vmem:[#allocation5 + $0x64] ss:$8 sps:$4 sm:$0xff]   ;;  %v1108_v4 = vld [vmem:[#allocation5 + $0x60] ss:$8 sps:$4 sm:$0xff]  }
  0x4d   :  { %222 = vmatpush1.bf16.msra.mxu0 %v1105_v2  ;;  %v1109_v5 = vld [vmem:[#allocation5 + $0x54] ss:$8 sps:$4 sm:$0xff]   ;;  %v1111_v6 = vld [vmem:[#allocation5 + $0x50] ss:$8 sps:$4 sm:$0xff]   ;;  %v1112_v7 = vld [vmem:[#allocation5 + $0x44] ss:$8 sps:$4 sm:$0xff]  }
  0x4e   :  { %223 = vmatprep.subr.bf16.mxu0 %v1106_v3  ;;  %v1114_v8 = vld [vmem:[#allocation5 + $0x40] ss:$8 sps:$4 sm:$0xff]   ;;  %v1115_v9 = vld [vmem:[#allocation5 + $0x34] ss:$8 sps:$4 sm:$0xff]   ;;  %v1130_v11 = vld [vmem:[#allocation7 + $0x70] ss:$8 sps:$4 sm:$0xff]  }
  0x4f   :  { %v1128_v10 = vld [vmem:[#allocation7 + $0x74] ss:$8 sps:$4 sm:$0xff]   ;;  %v1131_v12 = vld [vmem:[#allocation7 + $0x64] ss:$8 sps:$4 sm:$0xff]   ;;  %v1117_v13 = vld [vmem:[#allocation5 + $0x30] ss:$8 sps:$4 sm:$0xff]  }
  0x50   :  { %475 = vmatprep.subr.bf16.mxu1 %v1128_v10  ;;  %v1133_v14 = vld [vmem:[#allocation7 + $0x60] ss:$8 sps:$4 sm:$0xff]   ;;  %v1118_v15 = vld [vmem:[#allocation5 + $0x24] ss:$8 sps:$4 sm:$0xff]   ;;  %v1134_v16 = vld [vmem:[#allocation7 + $0x54] ss:$8 sps:$4 sm:$0xff]  }
  0x51   :  { %224 = vmatpush1.bf16.msra.mxu0 %v1108_v4  ;;  %476 = vmatpush1.bf16.msra.mxu1 %v1130_v11  ;;  %v1120_v17 = vld [vmem:[#allocation5 + $0x20] ss:$8 sps:$4 sm:$0xff]   ;;  %v1136_v18 = vld [vmem:[#allocation7 + $0x50] ss:$8 sps:$4 sm:$0xff]   ;;  %v1121_v19 = vld [vmem:[#allocation5 + $0x14] ss:$8 sps:$4 sm:$0xff]  }
  0x52   :  { %225 = vmatprep.subr.bf16.mxu0 %v1109_v5  ;;  %477 = vmatprep.subr.bf16.mxu1 %v1131_v12  ;;  %v1137_v20 = vld [vmem:[#allocation7 + $0x44] ss:$8 sps:$4 sm:$0xff]   ;;  %v1123_v21 = vld [vmem:[#allocation5 + $0x10] ss:$8 sps:$4 sm:$0xff]   ;;  %v1139_v22 = vld [vmem:[#allocation7 + $0x40] ss:$8 sps:$4 sm:$0xff]   ;;  %v125_v12 = vlaneseq }
  0x53   :  { %v1124_v23 = vld [vmem:[#allocation5 + $0x4] ss:$8 sps:$4 sm:$0xff]   ;;  %v1140_v24 = vld [vmem:[#allocation7 + $0x34] ss:$8 sps:$4 sm:$0xff]   ;;  %v1126_v25 = vld [vmem:[#allocation5] ss:$8 sps:$4 sm:$0xff]  }
  0x54   :  { %v1142_v26 = vld [vmem:[#allocation7 + $0x30] ss:$8 sps:$4 sm:$0xff]   ;;  %v1143_v28 = vld [vmem:[#allocation7 + $0x24] ss:$8 sps:$4 sm:$0xff]   ;;  %v1145_v29 = vld [vmem:[#allocation7 + $0x20] ss:$8 sps:$4 sm:$0xff]  }
  0x55   :  { %226 = vmatpush1.bf16.msra.mxu0 %v1111_v6  ;;  %478 = vmatpush1.bf16.msra.mxu1 %v1133_v14  ;;  %v1127_v27 = vld [vmem:[#allocation2] sm:$0xff]   ;;  %v1149_v32 = vld [vmem:[#allocation7 + $0x4] ss:$8 sps:$4 sm:$0xff]   ;;  %v1151_v33 = vld [vmem:[#allocation7] ss:$8 sps:$4 sm:$0xff]   ;;  %s957_s5 = sshll.u32 %s1401_s4, 4  ;;  %s958_s5 = int_to_ptr.vmem [resolvable:$true] %s957_s5 }
  0x56   :  { %227 = vmatprep.subr.bf16.mxu0 %v1112_v7  ;;  %479 = vmatprep.subr.bf16.mxu1 %v1134_v16  ;;  %v1146_v30 = vld [vmem:[#allocation7 + $0x14] ss:$8 sps:$4 sm:$0xff]   ;;  %v1148_v31 = vld [vmem:[#allocation7 + $0x10] ss:$8 sps:$4 sm:$0xff]   ;;  %v1155_v36 = vld [vmem:[#allocation7 + $0xe4] ss:$8 sps:$4 sm:$0xff]   ;;  %p1365_p3 = scmp.lt.s32.totalorder %s958_s5, %s958_s5 }
  0x57   :  { %v1152_v34 = vld [vmem:[#allocation7 + $0xf4] ss:$8 sps:$4 sm:$0xff]   ;;  %v1154_v35 = vld [vmem:[#allocation7 + $0xf0] ss:$8 sps:$4 sm:$0xff]   ;;  %v1157_v37 = vld [vmem:[#allocation7 + $0xe0] ss:$8 sps:$4 sm:$0xff]  }
  0x58   :  { %v1158_v38 = vld [vmem:[#allocation7 + $0xd4] ss:$8 sps:$4 sm:$0xff]   ;;  %v1160_v39 = vld [vmem:[#allocation7 + $0xd0] ss:$8 sps:$4 sm:$0xff]   ;;  %v1161_v40 = vld [vmem:[#allocation7 + $0xc4] ss:$8 sps:$4 sm:$0xff]  }
  0x59   :  { %228 = vmatpush1.bf16.msra.mxu0 %v1114_v8  ;;  %480 = vmatpush1.bf16.msra.mxu1 %v1136_v18  ;;  %v1163_v41 = vld [vmem:[#allocation7 + $0xc0] ss:$8 sps:$4 sm:$0xff]   ;;  %v1164_v42 = vld [vmem:[#allocation7 + $0xb4] ss:$8 sps:$4 sm:$0xff]   ;;  %v1166_v43 = vld [vmem:[#allocation7 + $0xb0] ss:$8 sps:$4 sm:$0xff]  }
  0x5a   :  { %229 = vmatprep.subr.bf16.mxu0 %v1115_v9  ;;  %481 = vmatprep.subr.bf16.mxu1 %v1137_v20  ;;  %v1167_v44 = vld [vmem:[#allocation7 + $0xa4] ss:$8 sps:$4 sm:$0xff]   ;;  %v1169_v45 = vld [vmem:[#allocation7 + $0xa0] ss:$8 sps:$4 sm:$0xff]   ;;  %v1170_v46 = vld [vmem:[#allocation7 + $0x94] ss:$8 sps:$4 sm:$0xff]  }
  0x5b   :  { %v1172_v47 = vld [vmem:[#allocation7 + $0x90] ss:$8 sps:$4 sm:$0xff]   ;;  %v1173_v48 = vld [vmem:[#allocation7 + $0x84] ss:$8 sps:$4 sm:$0xff]   ;;  %v1175_v49 = vld [vmem:[#allocation7 + $0x80] ss:$8 sps:$4 sm:$0xff]  }
  0x5c   :  { %v1176_v50 = vld [vmem:[#allocation8 + $0x70] ss:$8 sps:$4 sm:$0xff]   ;;  %v1178_v51 = vld [vmem:[#allocation8 + $0x74] ss:$8 sps:$4 sm:$0xff]   ;;  %v1181_v52 = vld [vmem:[#allocation8 + $0x64] ss:$8 sps:$4 sm:$0xff]  }
  0x5d   :  { %230 = vmatpush1.bf16.msra.mxu0 %v1117_v13  ;;  %482 = vmatpush1.bf16.msra.mxu1 %v1139_v22  ;;  %v1179_v53 = vld [vmem:[#allocation8 + $0x60] ss:$8 sps:$4 sm:$0xff]   ;;  %v1184_v54 = vld [vmem:[#allocation8 + $0x54] ss:$8 sps:$4 sm:$0xff]   ;;  %v1182_v55 = vld [vmem:[#allocation8 + $0x50] ss:$8 sps:$4 sm:$0xff]  }
  0x5e   :  { %231 = vmatprep.subr.bf16.mxu0 %v1118_v15  ;;  %483 = vmatprep.subr.bf16.mxu1 %v1140_v24  ;;  %v1187_v56 = vld [vmem:[#allocation8 + $0x44] ss:$8 sps:$4 sm:$0xff]   ;;  %v1185_v57 = vld [vmem:[#allocation8 + $0x40] ss:$8 sps:$4 sm:$0xff]   ;;  %v1190_v58 = vld [vmem:[#allocation8 + $0x34] ss:$8 sps:$4 sm:$0xff]  }
  0x5f   :  { %v1188_v59 = vld [vmem:[#allocation8 + $0x30] ss:$8 sps:$4 sm:$0xff]   ;;  %v1193_v60 = vld [vmem:[#allocation8 + $0x24] ss:$8 sps:$4 sm:$0xff]   ;;  %v1191_v61 = vld [vmem:[#allocation8 + $0x20] ss:$8 sps:$4 sm:$0xff]  }
  0x60   :  { %v1196_v62 = vld [vmem:[#allocation8 + $0x14] ss:$8 sps:$4 sm:$0xff]   ;;  %v1194_v63 = vld [vmem:[#allocation8 + $0x10] ss:$8 sps:$4 sm:$0xff]   ;;  %v1199_v0 = vld [vmem:[#allocation8 + $0x4] ss:$8 sps:$4 sm:$0xff]  }
  0x61   :  { %232 = vmatpush1.bf16.msra.mxu0 %v1120_v17  ;;  %484 = vmatpush1.bf16.msra.mxu1 %v1142_v26  ;;  %v1197_v1 = vld [vmem:[#allocation8] ss:$8 sps:$4 sm:$0xff]   ;;  %v1202_v2 = vld [vmem:[#allocation8 + $0xf4] ss:$8 sps:$4 sm:$0xff]   ;;  %v1200_v3 = vld [vmem:[#allocation8 + $0xf0] ss:$8 sps:$4 sm:$0xff]  }
  0x62   :  { %233 = vmatprep.subr.bf16.mxu0 %v1121_v19  ;;  %485 = vmatprep.subr.bf16.mxu1 %v1143_v28  ;;  %v1205_v4 = vld [vmem:[#allocation8 + $0xe4] ss:$8 sps:$4 sm:$0xff]   ;;  %v1203_v5 = vld [vmem:[#allocation8 + $0xe0] ss:$8 sps:$4 sm:$0xff]   ;;  %v1208_v6 = vld [vmem:[#allocation8 + $0xd4] ss:$8 sps:$4 sm:$0xff]  }
  0x63   :  { %v1206_v7 = vld [vmem:[#allocation8 + $0xd0] ss:$8 sps:$4 sm:$0xff]   ;;  %v1211_v8 = vld [vmem:[#allocation8 + $0xc4] ss:$8 sps:$4 sm:$0xff]   ;;  %v1209_v9 = vld [vmem:[#allocation8 + $0xc0] ss:$8 sps:$4 sm:$0xff]  }
  0x64   :  { %v1214_v10 = vld [vmem:[#allocation8 + $0xb4] ss:$8 sps:$4 sm:$0xff]   ;;  %v1212_v11 = vld [vmem:[#allocation8 + $0xb0] ss:$8 sps:$4 sm:$0xff]   ;;  %v126_v13 = vshrl.u32 %v125_v12, 7  ;;  %s1360_s29 = scalar_lea.vmem %s958_s5, 256 }
  0x65   :  { %234 = vmatpush1.bf16.msra.mxu0 %v1123_v21  ;;  %486 = vmatpush1.bf16.msra.mxu1 %v1145_v29  ;;  %v107_v16 = vld [vmem:[#allocation11] ss:$8 sm:$0x3]  ;;  %p1361_p2 = scmp.ne.s32.totalorder %s958_s5, %s1360_s29  ;;  %p1366_p4 = scmp.lt.s32.totalorder %s1360_s29, %s1360_s29 }
  0x66   :  { %235 = vmatprep.subr.bf16.mxu0 %v1124_v23  ;;  %487 = vmatprep.subr.bf16.mxu1 %v1146_v30  ;;  %v1464_v14 = vsub.s32 1, %v126_v13  ;;  %v1466_v15 = vsub.s32 0, %v126_v13 }
  0x67   :  { %p1367_p5 = por %p1366_p4, %p1365_p3 }
  0x68   :  { %v132_v18 = vrot.slane %v107_v16, %v1464_v14  ;;  %v128_v19 = vrot.slane %v107_v16, %v1466_v15 }
  0x69   :  { %236 = vmatpush1.bf16.msra.mxu0 %v1126_v25  ;;  %488 = vmatpush1.bf16.msra.mxu1 %v1148_v31  ;;  %p1368_p6 = pnand %p1367_p5, %p1361_p2 }
  0x6a   :  { %489 = vmatprep.subr.bf16.mxu1 %v1149_v32  ;;  %729 = vmatprep.subr.bf16.mxu0 %v1178_v51 }
  0x6c   :  { %254 = vmatmul.mubr.bf16.vlgmr.msra.gmra.mxu0 %v1127_v27 }
  0x6d   :  { %490 = vmatpush1.bf16.msra.mxu1 %v1151_v33  ;;  %730 = vmatpush1.bf16.msra.mxu0 %v1176_v50  ;;  %v1217_v33 = vld [vmem:[#allocation8 + $0xa4] ss:$8 sps:$4 sm:$0xff]  }
  0x6e   :  { %491 = vmatprep.subr.bf16.mxu1 %v1152_v34  ;;  %731 = vmatprep.subr.bf16.mxu0 %v1181_v52  ;;  %v1215_v34 = vld [vmem:[#allocation8 + $0xa0] ss:$8 sps:$4 sm:$0xff]  }
  0x71   :  { %492 = vmatpush2.bf16.msra.mxu1 %v1154_v35  ;;  %732 = vmatpush1.bf16.msra.mxu0 %v1179_v53  ;;  %v1220_v35 = vld [vmem:[#allocation8 + $0x94] ss:$8 sps:$4 sm:$0xff]  }
  0x72   :  { %493 = vmatprep.subr.bf16.mxu1 %v1155_v36  ;;  %733 = vmatprep.subr.bf16.mxu0 %v1184_v54  ;;  %v1218_v36 = vld [vmem:[#allocation8 + $0x90] ss:$8 sps:$4 sm:$0xff]  }
  0x75   :  { %494 = vmatpush2.bf16.msra.mxu1 %v1157_v37  ;;  %734 = vmatpush1.bf16.msra.mxu0 %v1182_v55  ;;  %v1223_v37 = vld [vmem:[#allocation8 + $0x84] ss:$8 sps:$4 sm:$0xff]  }
  0x76   :  { %495 = vmatprep.subr.bf16.mxu1 %v1158_v38  ;;  %735 = vmatprep.subr.bf16.mxu0 %v1187_v56  ;;  %v1221_v38 = vld [vmem:[#allocation8 + $0x80] ss:$8 sps:$4 sm:$0xff]  }
  0x79   :  { %496 = vmatpush2.bf16.msra.mxu1 %v1160_v39  ;;  %736 = vmatpush1.bf16.msra.mxu0 %v1185_v57  ;;  %v1224_v39 = vld [vmem:[#allocation10 + $0x78] sm:$0xff]  }
  0x7a   :  { %497 = vmatprep.subr.bf16.mxu1 %v1161_v40  ;;  %737 = vmatprep.subr.bf16.mxu0 %v1190_v58  ;;  %v1225_v40 = vld [vmem:[#allocation10 + $0x38] sm:$0xff]  }
  0x7d   :  { %498 = vmatpush2.bf16.msra.mxu1 %v1163_v41  ;;  %738 = vmatpush1.bf16.msra.mxu0 %v1188_v59  ;;  %v1226_v41 = vld [vmem:[#allocation10 + $0x70] sm:$0xff]  }
  0x7e   :  { %499 = vmatprep.subr.bf16.mxu1 %v1164_v42  ;;  %739 = vmatprep.subr.bf16.mxu0 %v1193_v60  ;;  %v1227_v42 = vld [vmem:[#allocation10 + $0x30] sm:$0xff]  }
  0x81   :  { %500 = vmatpush2.bf16.msra.mxu1 %v1166_v43  ;;  %740 = vmatpush1.bf16.msra.mxu0 %v1191_v61  ;;  %v1228_v43 = vld [vmem:[#allocation10 + $0x68] sm:$0xff]  }
  0x82   :  { %501 = vmatprep.subr.bf16.mxu1 %v1167_v44  ;;  %741 = vmatprep.subr.bf16.mxu0 %v1196_v62  ;;  %v1229_v44 = vld [vmem:[#allocation10 + $0x28] sm:$0xff]  }
  0x85   :  { %502 = vmatpush2.bf16.msra.mxu1 %v1169_v45  ;;  %742 = vmatpush1.bf16.msra.mxu0 %v1194_v63  ;;  %v1230_v45 = vld [vmem:[#allocation10 + $0x60] sm:$0xff]  }
  0x86   :  { %503 = vmatprep.subr.bf16.mxu1 %v1170_v46  ;;  %743 = vmatprep.subr.bf16.mxu0 %v1199_v0  ;;  %v1231_v46 = vld [vmem:[#allocation10 + $0x20] sm:$0xff]  }
  0x89   :  { %504 = vmatpush2.bf16.msra.mxu1 %v1172_v47  ;;  %744 = vmatpush1.bf16.msra.mxu0 %v1197_v1  ;;  %v1232_v47 = vld [vmem:[#allocation10 + $0x58] sm:$0xff]  }
  0x8a   :  { %505 = vmatprep.subr.bf16.mxu1 %v1173_v48  ;;  %745 = vmatprep.subr.bf16.mxu0 %v1202_v2  ;;  %v1233_v48 = vld [vmem:[#allocation10 + $0x18] sm:$0xff]   ;;  %v1234_v2 = vld [vmem:[#allocation10 + $0x50] sm:$0xff]  }
  0x8d   :  { %506 = vmatpush2.bf16.msra.mxu1 %v1175_v49  ;;  %746 = vmatpush2.bf16.msra.mxu0 %v1200_v3  ;;  %v271_v49 = vld [vmem:[#allocation11 + $0x1] ss:$8 sm:$0x3]  ;;  %v1235_v3 = vld [vmem:[#allocation10 + $0x10] sm:$0xff]  }
  0x8e   :  { %747 = vmatprep.subr.bf16.mxu0 %v1205_v4  ;;  %1069 = vmatprep.subr.bf16.mxu1 %v1224_v39  ;;  %v312_v51 = vrot.slane %v271_v49, %v1464_v14  ;;  %v308_v52 = vrot.slane %v271_v49, %v1466_v15  ;;  %v1236_v4 = vld [vmem:[#allocation10 + $0x48] sm:$0xff]  }
  0x91   :  { %748 = vmatpush2.bf16.msra.mxu0 %v1203_v5  ;;  %v1237_v5 = vld [vmem:[#allocation10 + $0x8] sm:$0xff]  }
  0x92   :  { %749 = vmatprep.subr.bf16.mxu0 %v1208_v6  ;;  %v1238_v6 = vld [vmem:[#allocation10 + $0x40] sm:$0xff]  }
  0x95   :  { %750 = vmatpush2.bf16.msra.mxu0 %v1206_v7  ;;  %v1239_v7 = vld [vmem:[#allocation10] sm:$0xff]  }
  0x96   :  { %751 = vmatprep.subr.bf16.mxu0 %v1211_v8  ;;  %v525_v8 = vld [vmem:[#allocation11 + $0x2] ss:$8 sm:$0x3] }
  0x99   :  { %752 = vmatpush2.bf16.msra.mxu0 %v1209_v9 }
  0x9a   :  { %753 = vmatprep.subr.bf16.mxu0 %v1214_v10  ;;  %v566_v10 = vrot.slane %v525_v8, %v1464_v14 }
  0x9d   :  { %754 = vmatpush2.bf16.msra.mxu0 %v1212_v11  ;;  %v562_v11 = vrot.slane %v525_v8, %v1466_v15 }
  0x9e   :  { %755 = vmatprep.subr.bf16.mxu0 %v1217_v33 }
  0xa1   :  { %756 = vmatpush2.bf16.msra.mxu0 %v1215_v34 }
  0xa2   :  { %757 = vmatprep.subr.bf16.mxu0 %v1220_v35 }
  0xa5   :  { %758 = vmatpush2.bf16.msra.mxu0 %v1218_v36 }
  0xa6   :  { %759 = vmatprep.subr.bf16.mxu0 %v1223_v37 }
  0xa9   :  { %760 = vmatpush2.bf16.msra.mxu0 %v1221_v38 }
 0x12c   :  { %v255_v17 = vpop.f32.mrf.mxu0 }
 0x12d   :  { %v256_v24 = vadd.f32 %v255_v17, %v128_v19 }
 0x12e   :  { %v257_v20 = vpop.f32.mrf.mxu0 }
 0x12f   :  { %v258_v22 = vadd.f32 %v257_v20, %v132_v18  ;;  %v264_v30 = vmax.f32 %v256_v24, 0.0 }
 0x130   :  { %v259_v21 = vpop.f32.mrf.mxu0 }
 0x131   :  { %v260_v23 = vadd.f32 %v259_v21, %v128_v19  ;;  %v265_v28 = vmax.f32 %v258_v22, 0.0 }
 0x132   :  { %v261_v25 = vpop.f32.mrf.mxu0 }
 0x133   :  { %v262_v26 = vadd.f32 %v261_v25, %v132_v18  ;;  %v266_v27 = vmax.f32 %v260_v23, 0.0 }
 0x135   :  { %v267_v29 = vmax.f32 %v262_v26, 0.0  ;;  %v268_v32 = vpack.c.bf16 %v266_v27, %v264_v30 }
 0x137   :  { %v269_v31 = vpack.c.bf16 %v267_v29, %v265_v28  ;;  %v778_v28 = vld [vmem:[#allocation11 + $0x3] ss:$0 sm:$0xff] }
 0x139   :  { %507 = vmatprep.mubr.bf16.mxu1 %v269_v31 }
 0x13a   :  { %508 = vmatmul.mubr.bf16.vlgmr.msra.gmra.mxu1 %v268_v32 }
 0x13b   :  { %1070 = vmatpush3.bf16.msra.mxu1 %v1225_v40 }
 0x13c   :  { %1071 = vmatprep.subr.bf16.mxu1 %v1226_v41 }
 0x13f   :  { %1072 = vmatpush3.bf16.msra.mxu1 %v1227_v42 }
 0x140   :  { %1073 = vmatprep.subr.bf16.mxu1 %v1228_v43 }
 0x143   :  { %1074 = vmatpush3.bf16.msra.mxu1 %v1229_v44 }
 0x144   :  { %1075 = vmatprep.subr.bf16.mxu1 %v1230_v45 }
 0x147   :  { %1076 = vmatpush3.bf16.msra.mxu1 %v1231_v46 }
 0x148   :  { %1077 = vmatprep.subr.bf16.mxu1 %v1232_v47 }
 0x14b   :  { %1078 = vmatpush3.bf16.msra.mxu1 %v1233_v48 }
 0x14c   :  { %1079 = vmatprep.subr.bf16.mxu1 %v1234_v2 }
 0x14f   :  { %1080 = vmatpush3.bf16.msra.mxu1 %v1235_v3 }
 0x150   :  { %1081 = vmatprep.subr.bf16.mxu1 %v1236_v4 }
 0x153   :  { %1082 = vmatpush3.bf16.msra.mxu1 %v1237_v5 }
 0x154   :  { %1083 = vmatprep.subr.bf16.mxu1 %v1238_v6 }
 0x157   :  { %1084 = vmatpush3.bf16.msra.mxu1 %v1239_v7 }
 0x1fa   :  { %v509_v50 = vpop.f32.mrf.mxu1 }
 0x1fb   :  { %v510_v57 = vadd.f32 %v509_v50, %v308_v52 }
 0x1fc   :  { %v511_v53 = vpop.f32.mrf.mxu1 }
 0x1fd   :  { %v512_v55 = vadd.f32 %v511_v53, %v312_v51  ;;  %v518_v63 = vmax.f32 %v510_v57, 0.0 }
 0x1fe   :  { %v513_v54 = vpop.f32.mrf.mxu1 }
 0x1ff   :  { %v514_v56 = vadd.f32 %v513_v54, %v308_v52  ;;  %v519_v61 = vmax.f32 %v512_v55, 0.0 }
 0x200   :  { %v515_v58 = vpop.f32.mrf.mxu1 }
 0x201   :  { %v516_v59 = vadd.f32 %v515_v58, %v312_v51  ;;  %v520_v60 = vmax.f32 %v514_v56, 0.0 }
 0x203   :  { %v521_v62 = vmax.f32 %v516_v59, 0.0  ;;  %v522_v1 = vpack.c.bf16 %v520_v60, %v518_v63 }
 0x205   :  { %v523_v0 = vpack.c.bf16 %v521_v62, %v519_v61 }
 0x207   :  { %761 = vmatprep.mubr.bf16.mxu0 %v523_v0 }
 0x208   :  { %762 = vmatmul.mubr.bf16.vlgmr.msra.gmra.mxu0 %v522_v1 }
 0x2c8   :  { %v763_v9 = vpop.f32.mrf.mxu0 }
 0x2c9   :  { %v764_v18 = vadd.f32 %v763_v9, %v562_v11 }
 0x2ca   :  { %v765_v12 = vpop.f32.mrf.mxu0 }
 0x2cb   :  { %v766_v16 = vadd.f32 %v765_v12, %v566_v10  ;;  %v772_v24 = vmax.f32 %v764_v18, 0.0 }
 0x2cc   :  { %v767_v13 = vpop.f32.mrf.mxu0 }
 0x2cd   :  { %v768_v17 = vadd.f32 %v767_v13, %v562_v11  ;;  %v773_v22 = vmax.f32 %v766_v16, 0.0 }
 0x2ce   :  { %v769_v19 = vpop.f32.mrf.mxu0 }
 0x2cf   :  { %v770_v20 = vadd.f32 %v769_v19, %v566_v10  ;;  %v774_v21 = vmax.f32 %v768_v17, 0.0 }
 0x2d1   :  { %v775_v23 = vmax.f32 %v770_v20, 0.0  ;;  %v776_v26 = vpack.c.bf16 %v774_v21, %v772_v24 }
 0x2d3   :  { %v777_v25 = vpack.c.bf16 %v775_v23, %v773_v22 }
 0x2d5   :  { %939 = vmatprep.mubr.bf16.mxu1 %v777_v25 }
 0x2d6   :  { %940 = vmatmul.mubr.bf16.vlgmr.msra.gmra.mxu1 %v776_v26 }
 0x396   :  { %v1085_v27 = vpop.f32.mrf.mxu1 }
 0x398   :  { %v1086_v14 = vpop.f32.mrf.mxu1 }
 0x399   :  { %v1087_v29 = vadd.f32 %v1086_v14, %v1085_v27 }
 0x39a   :  { %v1088_v15 = vpop.f32.mrf.mxu1 }
 0x39b   :  { %v942_v30 = vadd.f32 %v1087_v29, %v778_v28 }
 0x39c   :  { %v1089_v31 = vpop.f32.mrf.mxu1 }
 0x39d   :  { %v948_v32 = vmax.f32 %v942_v30, 0.0  ;;  %v1090_v33 = vadd.f32 %v1089_v31, %v1088_v15 }
 0x39f   :  { %950 = vst [vmem:[#allocation13] sm:$0xff] %v948_v32  ;;  %v945_v34 = vadd.f32 %v1090_v33, %v778_v28 }
 0x3a1   :  { %v949_v35 = vmax.f32 %v945_v34, 0.0 }
 0x3a3   :  { %951 = vst [vmem:[#allocation13 + $0x8] sm:$0xff] %v949_v35 }
 0x3a4   :  { %1371 = shalt.err (!%p1368_p6)
}
 0x3a5   :  { %963 = dma.vmem_to_hbm [thread:$0]  %s958_s5, 256, %s1486_s6, [#allocation4], %s1391_s24, %s1391_s24, %s1392_s25  }
 0x3a6   :  { %1388 = dma.done.wait [#allocation4], 256  }
 0x3a7   :  { %1389 = vsyncadd [#allocation4], 4294967040 }
 0x3a8   :  { %967 = vsyncpa [#allocation3], 1 }
 0x3a9   :  { %968 = vsyncpa [#allocation6], 1 }
 0x3aa   :  { %969 = vsyncpa [#allocation9], 1 }
 0x3ab   :  { %970 = vsyncpa [#allocation12], 1 }
 0x3ac   :  { %971 = vsyncpa [#allocation4], 1 }

</bundles_post_ra>
